<compile_context>
chip_gen: v6e
topology: v6e:2x2x1
jax: 0.10.0
libtpu: 0.0.40
codegen_flags: <defaults>
</compile_context>

<pallas_src>
import jax
import jax.numpy as jnp
from jax import lax
from jax.experimental import pallas as pl
from jax.experimental.pallas import tpu as pltpu


def _self_attention(x, lens, w_col, b_scalar):
    """SelfAttention.forward (eval semantics) on one batch block.

    x        : [bB, S, H] float32
    lens     : [bB, 1]    int32
    w_col    : [H, 128]   float32 (scorer weight in column 0, zeros elsewhere)
    b_scalar : ()         float32 (scorer bias, read from SMEM)
    returns  : [bB, H]    float32 context vectors
    """
    bB, S, H = x.shape

    # --- scores on the MXU: [bB*S, H] @ [H, 128] ---------------------------------
    x2d = x.reshape(bB * S, H)                                     # merge leading dims (cheap)
    s_full = jnp.dot(x2d, w_col, preferred_element_type=jnp.float32)   # [bB*S, 128]
    # Only lane 0 is non-zero -> lane-sum recovers the exact score and lands the
    # result as [bB, S] with S on the lane axis (good layout for the softmax).
    scores = jnp.sum(s_full.reshape(bB, S, 128), axis=-1) + b_scalar    # [bB, S]

    # --- length masking + softmax over the sequence axis --------------------------
    pos = lax.broadcasted_iota(jnp.int32, (bB, S), 1)
    scores = jnp.where(pos < lens, scores, -jnp.inf)
    m = jnp.max(scores, axis=1, keepdims=True)                          # [bB, 1]
    e = jnp.exp(scores - m)                                             # masked -> 0
    denom = jnp.sum(e, axis=1, keepdims=True)                           # [bB, 1]
    p = e * pl.reciprocal(denom, approx=True)                           # EUP divide

    # --- context on the MXU: [bB, 1, S] @ [bB, S, H] -> [bB, 1, H] ----------------
    ctx = jnp.einsum('bqs,bsh->bqh', p.reshape(bB, 1, S), x,
                     preferred_element_type=jnp.float32)
    return ctx.reshape(bB, H)


def san_head_kernel(tok_lens_ref, tree_lens_ref, seq_ref, tree_ref,
                    w_tok_ref, w_tree_ref, b_tok_ref, b_tree_ref,
                    w_mul_tok_ref, w_mul_tree_ref, b_mul_ref,
                    w_cls_ref, b_cls_ref,
                    logits_ref):
    seq = seq_ref[...]            # [bB, S, H]
    tree = tree_ref[...]          # [bB, T, H]

    atten_token = _self_attention(seq, tok_lens_ref[...],
                                  w_tok_ref[...], b_tok_ref[0])     # [bB, H]
    atten_tree = _self_attention(tree, tree_lens_ref[...],
                                 w_tree_ref[...], b_tree_ref[0])    # [bB, H]

    # concat-free modal projection: Linear(2H -> H) as two H x H dots into one acc.
    mul_modal = (jnp.dot(atten_token, w_mul_tok_ref[...],
                         preferred_element_type=jnp.float32)
                 + jnp.dot(atten_tree, w_mul_tree_ref[...],
                           preferred_element_type=jnp.float32)
                 + b_mul_ref[...])                                   # [bB, H]

    # scoring layer padded to lane-dense width (C_pad >= 128) -> unmasked stores.
    logits_ref[...] = (jnp.dot(mul_modal, w_cls_ref[...],
                               preferred_element_type=jnp.float32)
                       + b_cls_ref[...])                             # [bB, C_pad]


def prepare_params(params):
    """One-time weight massaging (transpose / split / lane padding). Hoisted out of
    the per-call path so no per-step XLA transpose sits on the launch critical path."""
    f32 = jnp.float32
    H = params["w_mul"].shape[0]
    C = params["w_cls"].shape[0]
    C_pad = ((C + 127) // 128) * 128     # lane-dense classifier width (>= 128)

    w_mul = params["w_mul"].astype(f32)                       # [H, 2H] (torch layout)
    return {
        "n_class": C,
        # SelfAttention scorers, padded into lane column 0 of an [H, 128] tile.
        "w_tok_col": jnp.zeros((H, 128), f32).at[:, 0].set(
            params["w_tok"].reshape(H).astype(f32)),
        "w_tree_col": jnp.zeros((H, 128), f32).at[:, 0].set(
            params["w_tree"].reshape(H).astype(f32)),
        "b_tok": params["b_tok"].reshape(1).astype(f32),       # SMEM scalar
        "b_tree": params["b_tree"].reshape(1).astype(f32),     # SMEM scalar
        # mul_modal_layer split into the token / tree halves, pre-transposed to [H, H].
        "w_mul_tok_t": w_mul[:, :H].T,
        "w_mul_tree_t": w_mul[:, H:].T,
        "b_mul": params["b_mul"].reshape(1, H).astype(f32),
        # scoring layer, pre-transposed and zero-padded to [H, C_pad].
        "w_cls_pad_t": jnp.zeros((H, C_pad), f32).at[:, :C].set(
            params["w_cls"].T.astype(f32)),
        "b_cls_pad": jnp.zeros((1, C_pad), f32).at[:, :C].set(
            params["b_cls"].reshape(1, C).astype(f32)),
    }


def san_bert_head_forward(sequence_output, token_lens, pad_tree, tree_lens,
                          prepared, *, block_b=None):
    """Grid over batch blocks; weights are full (resident) blocks; biases in SMEM."""
    B, S, H = sequence_output.shape
    T = pad_tree.shape[1]
    C = prepared["n_class"]
    C_pad = prepared["w_cls_pad_t"].shape[1]

    if block_b is None:
        # Toy sizes: one block. Real sizes: tile the batch (multiple of 8) so each
        # block's (seq + tree) fits scoped VMEM with double-buffering (re-derive for
        # v7x's smaller VMEM; raise vmem_limit_bytes via CompilerParams if needed).
        block_b = B if B <= 8 else 8
    assert B % block_b == 0, "batch must be divisible by block_b"
    grid = (B // block_b,)

    tok_lens2 = token_lens.reshape(B, 1).astype(jnp.int32)
    tree_lens2 = tree_lens.reshape(B, 1).astype(jnp.int32)

    smem = pl.BlockSpec(memory_space=pltpu.MemorySpace.SMEM)
    in_specs = [
        pl.BlockSpec((block_b, 1), lambda b: (b, 0)),            # token_lens
        pl.BlockSpec((block_b, 1), lambda b: (b, 0)),            # tree_lens
        pl.BlockSpec((block_b, S, H), lambda b: (b, 0, 0)),      # sequence_output
        pl.BlockSpec((block_b, T, H), lambda b: (b, 0, 0)),      # pad_tree
        pl.BlockSpec((H, 128), lambda b: (0, 0)),                # w_tok_col   (resident)
        pl.BlockSpec((H, 128), lambda b: (0, 0)),                # w_tree_col  (resident)
        smem,                                                    # b_tok scalar
        smem,                                                    # b_tree scalar
        pl.BlockSpec((H, H), lambda b: (0, 0)),                  # w_mul_tok_t
        pl.BlockSpec((H, H), lambda b: (0, 0)),                  # w_mul_tree_t
        pl.BlockSpec((1, H), lambda b: (0, 0)),                  # b_mul
        pl.BlockSpec((H, C_pad), lambda b: (0, 0)),              # w_cls_pad_t
        pl.BlockSpec((1, C_pad), lambda b: (0, 0)),              # b_cls_pad
    ]
    out_specs = pl.BlockSpec((block_b, C_pad), lambda b: (b, 0))

    logits_pad = pl.pallas_call(
        san_head_kernel,
        out_shape=jax.ShapeDtypeStruct((B, C_pad), jnp.float32),
        grid=grid,
        in_specs=in_specs,
        out_specs=out_specs,
        compiler_params=pltpu.CompilerParams(
            dimension_semantics=("parallel",)),
    )(tok_lens2, tree_lens2, sequence_output, pad_tree,
      prepared["w_tok_col"], prepared["w_tree_col"],
      prepared["b_tok"], prepared["b_tree"],
      prepared["w_mul_tok_t"], prepared["w_mul_tree_t"], prepared["b_mul"],
      prepared["w_cls_pad_t"], prepared["b_cls_pad"])

    return logits_pad[:, :C]


def _reference(sequence_output, token_lens, pad_tree, tree_lens, params):
    """Pure-JAX reference of the same forward semantics."""
    def self_attn(x, lens, w, b):
        B, S, H = x.shape
        scores = jnp.einsum("bsh,h->bs", x, w.reshape(H)) + b.reshape(())
        pos = jnp.arange(S)[None, :]
        scores = jnp.where(pos < lens[:, None], scores, -jnp.inf)
        p = jax.nn.softmax(scores, axis=1)
        return jnp.einsum("bs,bsh->bh", p, x)

    at = self_attn(sequence_output, token_lens, params["w_tok"], params["b_tok"])
    ar = self_attn(pad_tree, tree_lens, params["w_tree"], params["b_tree"])
    cat = jnp.concatenate([at, ar], axis=1)
    mm = cat @ params["w_mul"].T + params["b_mul"]
    return mm @ params["w_cls"].T + params["b_cls"]


if __name__ == "__main__":
    # small shapes consistent with the module's forward
    B, S, H, T, C = 2, 8, 32, 6, 4          # batch, seq, hidden, tree max len, n_class
    init_ratio = 1.0
    std = 0.02 * init_ratio                 # _my_init: normal(0, 0.02*init_ratio), bias 0

    key = jax.random.PRNGKey(0)
    keys = jax.random.split(key, 8)

    # "BERT" sequence output (TODO(synk): real encoder not implemented)
    sequence_output = jax.random.normal(keys[0], (B, S, H), dtype=jnp.float32)

    # padded TreeLSTM hidden states (TODO(synk): real TreeLSTM not implemented)
    tree_lens = jnp.array([6, 4], dtype=jnp.int32)
    pad_tree = jax.random.normal(keys[1], (B, T, H), dtype=jnp.float32)
    tree_pos = jnp.arange(T)[None, :, None]
    pad_tree = jnp.where(tree_pos < tree_lens[:, None, None], pad_tree, 0.0)  # pad_sequence pads with 0

    # token_lens[i] == seq_len (as in the module)
    token_lens = jnp.full((B,), S, dtype=jnp.int32)

    # parameters, initialised like _my_init
    params = {
        "w_tok":  std * jax.random.normal(keys[2], (1, H), dtype=jnp.float32),     # SelfAttention scorer
        "b_tok":  jnp.zeros((1,), dtype=jnp.float32),
        "w_tree": std * jax.random.normal(keys[3], (1, H), dtype=jnp.float32),
        "b_tree": jnp.zeros((1,), dtype=jnp.float32),
        "w_mul":  std * jax.random.normal(keys[4], (H, 2 * H), dtype=jnp.float32),  # mul_modal_layer
        "b_mul":  jnp.zeros((H,), dtype=jnp.float32),
        "w_cls":  std * jax.random.normal(keys[5], (C, H), dtype=jnp.float32),      # scoring_list[task]
        "b_cls":  jnp.zeros((C,), dtype=jnp.float32),
    }

    prepared = prepare_params(params)   # one-time weight transposes / padding

    logits = san_bert_head_forward(sequence_output, token_lens, pad_tree, tree_lens, prepared)
    logits = jax.block_until_ready(logits)

    ref = _reference(sequence_output, token_lens, pad_tree, tree_lens, params)
    assert logits.shape == (B, C)
    assert jnp.allclose(logits, ref, atol=1e-4, rtol=1e-4), (logits, ref)

    print("KERNEL_OK")
</pallas_src>

<mosaic_0001>
module attributes {stable_mosaic.version = 11 : i64} {
  func.func @san_head_kernel(%arg0: i32, %arg1: memref<2x1xi32, #tpu.memory_space<vmem>>, %arg2: memref<2x1xi32, #tpu.memory_space<vmem>>, %arg3: memref<2x8x32xf32, #tpu.memory_space<vmem>>, %arg4: memref<2x6x32xf32, #tpu.memory_space<vmem>>, %arg5: memref<32x128xf32, #tpu.memory_space<vmem>>, %arg6: memref<32x128xf32, #tpu.memory_space<vmem>>, %arg7: memref<1xf32, #tpu.memory_space<smem>>, %arg8: memref<1xf32, #tpu.memory_space<smem>>, %arg9: memref<32x32xf32, #tpu.memory_space<vmem>>, %arg10: memref<32x32xf32, #tpu.memory_space<vmem>>, %arg11: memref<1x32xf32, #tpu.memory_space<vmem>>, %arg12: memref<32x128xf32, #tpu.memory_space<vmem>>, %arg13: memref<1x128xf32, #tpu.memory_space<vmem>>, %arg14: memref<2x128xf32, #tpu.memory_space<vmem>>) attributes {dimension_semantics = [#tpu.dimension_semantics<parallel>], iteration_bounds = array<i64: 1>, scalar_prefetch = 0 : i64, scratch_operands = 0 : i64, tpu.core_type = #tpu.core_type<tc>, window_params = [{transform_indices = @transform_0, window_bounds = array<i64: 2, 1>}, {transform_indices = @transform_1, window_bounds = array<i64: 2, 1>}, {transform_indices = @transform_2, window_bounds = array<i64: 2, 8, 32>}, {transform_indices = @transform_3, window_bounds = array<i64: 2, 6, 32>}, {pipeline_mode = #tpu.pipeline_mode<synchronous>, transform_indices = @transform_4, window_bounds = array<i64: 32, 128>}, {pipeline_mode = #tpu.pipeline_mode<synchronous>, transform_indices = @transform_5, window_bounds = array<i64: 32, 128>}, {transform_indices = @transform_6, window_bounds = array<i64: 1>}, {transform_indices = @transform_7, window_bounds = array<i64: 1>}, {pipeline_mode = #tpu.pipeline_mode<synchronous>, transform_indices = @transform_8, window_bounds = array<i64: 32, 32>}, {pipeline_mode = #tpu.pipeline_mode<synchronous>, transform_indices = @transform_9, window_bounds = array<i64: 32, 32>}, {pipeline_mode = #tpu.pipeline_mode<synchronous>, transform_indices = @transform_10, window_bounds = array<i64: 1, 32>}, {pipeline_mode = #tpu.pipeline_mode<synchronous>, transform_indices = @transform_11, window_bounds = array<i64: 32, 128>}, {pipeline_mode = #tpu.pipeline_mode<synchronous>, transform_indices = @transform_12, window_bounds = array<i64: 1, 128>}, {transform_indices = @transform_13, window_bounds = array<i64: 2, 128>}]} {
    %c0 = arith.constant 0 : index
    %c0_0 = arith.constant 0 : index
    %c0_1 = arith.constant 0 : index
    %0 = vector.load %arg3[%c0, %c0_0, %c0_1] : memref<2x8x32xf32, #tpu.memory_space<vmem>>, vector<2x8x32xf32>
    %c0_2 = arith.constant 0 : index
    %c0_3 = arith.constant 0 : index
    %c0_4 = arith.constant 0 : index
    %1 = vector.load %arg4[%c0_2, %c0_3, %c0_4] : memref<2x6x32xf32, #tpu.memory_space<vmem>>, vector<2x6x32xf32>
    %c0_5 = arith.constant 0 : index
    %c0_6 = arith.constant 0 : index
    %2 = vector.load %arg1[%c0_5, %c0_6] : memref<2x1xi32, #tpu.memory_space<vmem>>, vector<2x1xi32>
    %c0_7 = arith.constant 0 : index
    %c0_8 = arith.constant 0 : index
    %3 = vector.load %arg5[%c0_7, %c0_8] : memref<32x128xf32, #tpu.memory_space<vmem>>, vector<32x128xf32>
    %c0_9 = arith.constant 0 : index
    %4 = memref.load %arg7[%c0_9] : memref<1xf32, #tpu.memory_space<smem>>
    %5 = vector.shape_cast %0 : vector<2x8x32xf32> to vector<16x32xf32>
    %cst = arith.constant dense<0.000000e+00> : vector<16x128xf32>
    %6 = tpu.matmul %5, %3, %cst {dimension_numbers = #tpu.dot_dimension_numbers<[1], [0], [0], [1], [0, 0, 1, 1], [], []>} : vector<16x32xf32>, vector<32x128xf32>, vector<16x128xf32> -> vector<16x128xf32>
    %7 = vector.shape_cast %6 : vector<16x128xf32> to vector<2x8x128xf32>
    %cst_10 = arith.constant dense<0.000000e+00> : vector<2x8xf32>
    %8 = vector.multi_reduction <add>, %7, %cst_10 [2] : vector<2x8x128xf32> to vector<2x8xf32>
    %9 = vector.broadcast %4 : f32 to vector<2x8xf32>
    %10 = arith.addf %8, %9 : vector<2x8xf32>
    %11 = tpu.iota {dimensions = array<i32: 1>} : vector<2x8xi32>
    %12 = vector.broadcast %2 : vector<2x1xi32> to vector<2x8xi32>
    %13 = arith.cmpi slt, %11, %12 : vector<2x8xi32>
    %cst_11 = arith.constant 0xFF800000 : f32
    %14 = vector.broadcast %cst_11 : f32 to vector<2x8xf32>
    %15 = arith.select %13, %10, %14 : vector<2x8xi1>, vector<2x8xf32>
    %cst_12 = arith.constant dense<0xFF800000> : vector<2xf32>
    %16 = vector.multi_reduction <maximumf>, %15, %cst_12 [1] : vector<2x8xf32> to vector<2xf32>
    %17 = vector.shape_cast %16 : vector<2xf32> to vector<2x1xf32>
    %18 = vector.broadcast %17 : vector<2x1xf32> to vector<2x8xf32>
    %19 = arith.subf %15, %18 : vector<2x8xf32>
    %20 = math.exp %19 : vector<2x8xf32>
    %cst_13 = arith.constant dense<0.000000e+00> : vector<2xf32>
    %21 = vector.multi_reduction <add>, %20, %cst_13 [1] : vector<2x8xf32> to vector<2xf32>
    %22 = vector.shape_cast %21 : vector<2xf32> to vector<2x1xf32>
    %23 = tpu.reciprocal %22 {approx = true} : vector<2x1xf32> -> vector<2x1xf32>
    %24 = vector.broadcast %23 : vector<2x1xf32> to vector<2x8xf32>
    %25 = arith.mulf %20, %24 : vector<2x8xf32>
    %26 = vector.shape_cast %25 : vector<2x8xf32> to vector<2x1x8xf32>
    "tpu.trace_start"() <{level = 10 : i32, message = "bqs,bsh->bqh"}> : () -> ()
    %cst_14 = arith.constant dense<0.000000e+00> : vector<2x1x32xf32>
    %27 = tpu.matmul %26, %0, %cst_14 {dimension_numbers = #tpu.dot_dimension_numbers<[2], [1], [1], [2], [0, 0, 0, 1, 1, 2], [0], [0]>} : vector<2x1x8xf32>, vector<2x8x32xf32>, vector<2x1x32xf32> -> vector<2x1x32xf32>
    "tpu.trace_stop"() : () -> ()
    %28 = vector.shape_cast %27 : vector<2x1x32xf32> to vector<2x32xf32>
    %c0_15 = arith.constant 0 : index
    %c0_16 = arith.constant 0 : index
    %29 = vector.load %arg2[%c0_15, %c0_16] : memref<2x1xi32, #tpu.memory_space<vmem>>, vector<2x1xi32>
    %c0_17 = arith.constant 0 : index
    %c0_18 = arith.constant 0 : index
    %30 = vector.load %arg6[%c0_17, %c0_18] : memref<32x128xf32, #tpu.memory_space<vmem>>, vector<32x128xf32>
    %c0_19 = arith.constant 0 : index
    %31 = memref.load %arg8[%c0_19] : memref<1xf32, #tpu.memory_space<smem>>
    %32 = vector.shape_cast %1 : vector<2x6x32xf32> to vector<12x32xf32>
    %cst_20 = arith.constant dense<0.000000e+00> : vector<12x128xf32>
    %33 = tpu.matmul %32, %30, %cst_20 {dimension_numbers = #tpu.dot_dimension_numbers<[1], [0], [0], [1], [0, 0, 1, 1], [], []>} : vector<12x32xf32>, vector<32x128xf32>, vector<12x128xf32> -> vector<12x128xf32>
    %34 = vector.shape_cast %33 : vector<12x128xf32> to vector<2x6x128xf32>
    %cst_21 = arith.constant dense<0.000000e+00> : vector<2x6xf32>
    %35 = vector.multi_reduction <add>, %34, %cst_21 [2] : vector<2x6x128xf32> to vector<2x6xf32>
    %36 = vector.broadcast %31 : f32 to vector<2x6xf32>
    %37 = arith.addf %35, %36 : vector<2x6xf32>
    %38 = tpu.iota {dimensions = array<i32: 1>} : vector<2x6xi32>
    %39 = vector.broadcast %29 : vector<2x1xi32> to vector<2x6xi32>
    %40 = arith.cmpi slt, %38, %39 : vector<2x6xi32>
    %cst_22 = arith.constant 0xFF800000 : f32
    %41 = vector.broadcast %cst_22 : f32 to vector<2x6xf32>
    %42 = arith.select %40, %37, %41 : vector<2x6xi1>, vector<2x6xf32>
    %cst_23 = arith.constant dense<0xFF800000> : vector<2xf32>
    %43 = vector.multi_reduction <maximumf>, %42, %cst_23 [1] : vector<2x6xf32> to vector<2xf32>
    %44 = vector.shape_cast %43 : vector<2xf32> to vector<2x1xf32>
    %45 = vector.broadcast %44 : vector<2x1xf32> to vector<2x6xf32>
    %46 = arith.subf %42, %45 : vector<2x6xf32>
    %47 = math.exp %46 : vector<2x6xf32>
    %cst_24 = arith.constant dense<0.000000e+00> : vector<2xf32>
    %48 = vector.multi_reduction <add>, %47, %cst_24 [1] : vector<2x6xf32> to vector<2xf32>
    %49 = vector.shape_cast %48 : vector<2xf32> to vector<2x1xf32>
    %50 = tpu.reciprocal %49 {approx = true} : vector<2x1xf32> -> vector<2x1xf32>
    %51 = vector.broadcast %50 : vector<2x1xf32> to vector<2x6xf32>
    %52 = arith.mulf %47, %51 : vector<2x6xf32>
    %53 = vector.shape_cast %52 : vector<2x6xf32> to vector<2x1x6xf32>
    "tpu.trace_start"() <{level = 10 : i32, message = "bqs,bsh->bqh"}> : () -> ()
    %cst_25 = arith.constant dense<0.000000e+00> : vector<2x1x32xf32>
    %54 = tpu.matmul %53, %1, %cst_25 {dimension_numbers = #tpu.dot_dimension_numbers<[2], [1], [1], [2], [0, 0, 0, 1, 1, 2], [0], [0]>} : vector<2x1x6xf32>, vector<2x6x32xf32>, vector<2x1x32xf32> -> vector<2x1x32xf32>
    "tpu.trace_stop"() : () -> ()
    %55 = vector.shape_cast %54 : vector<2x1x32xf32> to vector<2x32xf32>
    %c0_26 = arith.constant 0 : index
    %c0_27 = arith.constant 0 : index
    %56 = vector.load %arg9[%c0_26, %c0_27] : memref<32x32xf32, #tpu.memory_space<vmem>>, vector<32x32xf32>
    %cst_28 = arith.constant dense<0.000000e+00> : vector<2x32xf32>
    %57 = tpu.matmul %28, %56, %cst_28 {dimension_numbers = #tpu.dot_dimension_numbers<[1], [0], [0], [1], [0, 0, 1, 1], [], []>} : vector<2x32xf32>, vector<32x32xf32>, vector<2x32xf32> -> vector<2x32xf32>
    %c0_29 = arith.constant 0 : index
    %c0_30 = arith.constant 0 : index
    %58 = vector.load %arg10[%c0_29, %c0_30] : memref<32x32xf32, #tpu.memory_space<vmem>>, vector<32x32xf32>
    %cst_31 = arith.constant dense<0.000000e+00> : vector<2x32xf32>
    %59 = tpu.matmul %55, %58, %cst_31 {dimension_numbers = #tpu.dot_dimension_numbers<[1], [0], [0], [1], [0, 0, 1, 1], [], []>} : vector<2x32xf32>, vector<32x32xf32>, vector<2x32xf32> -> vector<2x32xf32>
    %60 = arith.addf %57, %59 : vector<2x32xf32>
    %c0_32 = arith.constant 0 : index
    %c0_33 = arith.constant 0 : index
    %61 = vector.load %arg11[%c0_32, %c0_33] : memref<1x32xf32, #tpu.memory_space<vmem>>, vector<1x32xf32>
    %62 = vector.broadcast %61 : vector<1x32xf32> to vector<2x32xf32>
    %63 = arith.addf %60, %62 : vector<2x32xf32>
    %c0_34 = arith.constant 0 : index
    %c0_35 = arith.constant 0 : index
    %64 = vector.load %arg12[%c0_34, %c0_35] : memref<32x128xf32, #tpu.memory_space<vmem>>, vector<32x128xf32>
    %cst_36 = arith.constant dense<0.000000e+00> : vector<2x128xf32>
    %65 = tpu.matmul %63, %64, %cst_36 {dimension_numbers = #tpu.dot_dimension_numbers<[1], [0], [0], [1], [0, 0, 1, 1], [], []>} : vector<2x32xf32>, vector<32x128xf32>, vector<2x128xf32> -> vector<2x128xf32>
    %c0_37 = arith.constant 0 : index
    %c0_38 = arith.constant 0 : index
    %66 = vector.load %arg13[%c0_37, %c0_38] : memref<1x128xf32, #tpu.memory_space<vmem>>, vector<1x128xf32>
    %67 = vector.broadcast %66 : vector<1x128xf32> to vector<2x128xf32>
    %68 = arith.addf %65, %67 : vector<2x128xf32>
    %c0_39 = arith.constant 0 : index
    %c0_40 = arith.constant 0 : index
    %69 = vector.load %arg14[%c0_39, %c0_40] : memref<2x128xf32, #tpu.memory_space<vmem>>, vector<2x128xf32>
    tpu.vector_store %arg14[%c0_39, %c0_40], %68 {strides = array<i32>} : memref<2x128xf32, #tpu.memory_space<vmem>>, vector<2x128xf32>,
    return
  }
  func.func @transform_0(%arg0: i32) -> (i32, i32) {
    %c0_i32 = arith.constant 0 : i32
    %c0_i32_0 = arith.constant 0 : i32
    return %arg0, %c0_i32 : i32, i32
  }
  func.func @transform_1(%arg0: i32) -> (i32, i32) {
    %c0_i32 = arith.constant 0 : i32
    %c0_i32_0 = arith.constant 0 : i32
    return %arg0, %c0_i32 : i32, i32
  }
  func.func @transform_2(%arg0: i32) -> (i32, i32, i32) {
    %c0_i32 = arith.constant 0 : i32
    %c0_i32_0 = arith.constant 0 : i32
    %c0_i32_1 = arith.constant 0 : i32
    return %arg0, %c0_i32, %c0_i32_0 : i32, i32, i32
  }
  func.func @transform_3(%arg0: i32) -> (i32, i32, i32) {
    %c0_i32 = arith.constant 0 : i32
    %c0_i32_0 = arith.constant 0 : i32
    %c0_i32_1 = arith.constant 0 : i32
    return %arg0, %c0_i32, %c0_i32_0 : i32, i32, i32
  }
  func.func @transform_4(%arg0: i32) -> (i32, i32) {
    %c0_i32 = arith.constant 0 : i32
    %c0_i32_0 = arith.constant 0 : i32
    %c0_i32_1 = arith.constant 0 : i32
    return %c0_i32, %c0_i32_0 : i32, i32
  }
  func.func @transform_5(%arg0: i32) -> (i32, i32) {
    %c0_i32 = arith.constant 0 : i32
    %c0_i32_0 = arith.constant 0 : i32
    %c0_i32_1 = arith.constant 0 : i32
    return %c0_i32, %c0_i32_0 : i32, i32
  }
  func.func @transform_6(%arg0: i32) -> i32 {
    %c0_i32 = arith.constant 0 : i32
    %c0_i32_0 = arith.constant 0 : i32
    return %c0_i32 : i32
  }
  func.func @transform_7(%arg0: i32) -> i32 {
    %c0_i32 = arith.constant 0 : i32
    %c0_i32_0 = arith.constant 0 : i32
    return %c0_i32 : i32
  }
  func.func @transform_8(%arg0: i32) -> (i32, i32) {
    %c0_i32 = arith.constant 0 : i32
    %c0_i32_0 = arith.constant 0 : i32
    %c0_i32_1 = arith.constant 0 : i32
    return %c0_i32, %c0_i32_0 : i32, i32
  }
  func.func @transform_9(%arg0: i32) -> (i32, i32) {
    %c0_i32 = arith.constant 0 : i32
    %c0_i32_0 = arith.constant 0 : i32
    %c0_i32_1 = arith.constant 0 : i32
    return %c0_i32, %c0_i32_0 : i32, i32
  }
  func.func @transform_10(%arg0: i32) -> (i32, i32) {
    %c0_i32 = arith.constant 0 : i32
    %c0_i32_0 = arith.constant 0 : i32
    %c0_i32_1 = arith.constant 0 : i32
    return %c0_i32, %c0_i32_0 : i32, i32
  }
  func.func @transform_11(%arg0: i32) -> (i32, i32) {
    %c0_i32 = arith.constant 0 : i32
    %c0_i32_0 = arith.constant 0 : i32
    %c0_i32_1 = arith.constant 0 : i32
    return %c0_i32, %c0_i32_0 : i32, i32
  }
  func.func @transform_12(%arg0: i32) -> (i32, i32) {
    %c0_i32 = arith.constant 0 : i32
    %c0_i32_0 = arith.constant 0 : i32
    %c0_i32_1 = arith.constant 0 : i32
    return %c0_i32, %c0_i32_0 : i32, i32
  }
  func.func @transform_13(%arg0: i32) -> (i32, i32) {
    %c0_i32 = arith.constant 0 : i32
    %c0_i32_0 = arith.constant 0 : i32
    return %arg0, %c0_i32 : i32, i32
  }
}

</mosaic_0001>

<bundles_post_ra>
// kernel: tpu_custom_call.1
= control target key start
LH: loop header
LB: loop body
LE: loop exit
PB: predicated region body
PF: predicated region fallthrough
CT: control target
= control target key end

     0   :  { %20 = vsyncpa [#allocation5], 0  ;;  %s1619_s0 = inlined_call_operand.vmem [shape: s32[2,1], index: 0, kind: input, shape index: {}]   ;;  %s1620_s1 = inlined_call_operand.vmem [shape: s32[2,1], index: 1, kind: input, shape index: {}]   ;;  %s1621_s2 = inlined_call_operand.hbm [shape: f32[2,8,32], index: 2, kind: input, shape index: {}]   ;;  %s1622_s3 = inlined_call_operand.vmem [shape: f32[2,6,32], index: 3, kind: input, shape index: {}]   ;;  %s1623_s4 = inlined_call_operand.vmem [shape: f32[32,128], index: 4, kind: input, shape index: {}]   ;;  %s1624_s5 = inlined_call_operand.hbm [shape: f32[32,128], index: 5, kind: input, shape index: {}]   ;;  %s1625_s6 = inlined_call_operand.<no memory space> [shape: f32[1], index: 6, kind: input, shape index: {}]   ;;  %s1626_s7 = inlined_call_operand.<no memory space> [shape: f32[1], index: 7, kind: input, shape index: {}]   ;;  %s1627_s8 = inlined_call_operand.hbm [shape: f32[32,32], index: 8, kind: input, shape index: {}]   ;;  %s1628_s9 = inlined_call_operand.hbm [shape: f32[32,32], index: 9, kind: input, shape index: {}]   ;;  %s1629_s10 = inlined_call_operand.vmem [shape: f32[1,32], index: 10, kind: input, shape index: {}]   ;;  %s1630_s11 = inlined_call_operand.hbm [shape: f32[32,128], index: 11, kind: input, shape index: {}]   ;;  %s1631_s12 = inlined_call_operand.vmem [shape: f32[1,128], index: 12, kind: input, shape index: {}]   ;;  %s1632_s13 = inlined_call_operand.hbm [shape: f32[2,128], index: 13, kind: output, shape index: {}]  }
   0x1   :  { %21 = vsyncpa [#allocation8], 0 }
   0x2   :  { %22 = vsyncpa [#allocation11], 0 }
   0x3   :  { %23 = vsyncpa [#allocation6], 0  ;;  %s1378_s25 = smov [#allocation7]   ;;  %s1379_s27 = smov [#allocation10]  }
   0x4   :  { %s49_s26 = sshll.u32 %s1378_s25, 4  ;;  %s77_s28 = sshll.u32 %s1379_s27, 4  ;;  %s50_s26 = int_to_ptr.vmem [resolvable:$true] %s49_s26  ;;  %s78_s28 = int_to_ptr.vmem [resolvable:$true] %s77_s28 }
   0x5   :  { %s1258_s29 = scalar_lea.vmem %s50_s26, 512  ;;  %p1263_p1 = scmp.lt.s32.totalorder %s50_s26, %s50_s26 }
   0x6   :  { %p1259_p0 = scmp.ne.s32.totalorder %s50_s26, %s1258_s29  ;;  %p1264_p2 = scmp.lt.s32.totalorder %s1258_s29, %s1258_s29 }
   0x8   :  { %p1265_p3 = por %p1264_p2, %p1263_p1 }
   0xa   :  { %p1266_p4 = pnand %p1265_p3, %p1259_p0 }
   0xc   :  { %1269 = shalt.err (!%p1266_p4)
}
   0xd   :  { %s1380_s30 = smov 128   ;;  %s1381_s14 = smov 8  }
   0xe   :  { %55 = dma.hbm_to_vmem [thread:$0]  %s1624_s5, 512, %s50_s26, [#allocation8], %s1380_s30, %s1380_s30, %s1381_s14  }
   0xf   :  { %s1278_s17 = scalar_lea.vmem %s78_s28, 512  ;;  %p1283_p6 = scmp.lt.s32.totalorder %s78_s28, %s78_s28 }
  0x10   :  { %p1279_p5 = scmp.ne.s32.totalorder %s78_s28, %s1278_s17  ;;  %p1284_p7 = scmp.lt.s32.totalorder %s1278_s17, %s1278_s17 }
  0x12   :  { %p1285_p8 = por %p1284_p7, %p1283_p6 }
  0x14   :  { %p1286_p9 = pnand %p1285_p8, %p1279_p5 }
  0x16   :  { %1289 = shalt.err (!%p1286_p9)
}
  0x17   :  { %83 = dma.hbm_to_vmem [thread:$0]  %s1628_s9, 512, %s78_s28, [#allocation11], %s1380_s30, %s1380_s30, %s1381_s14  }
  0x18   :  { %s1382_s20 = smov [#allocation4]   ;;  %s1383_s22 = smov [#allocation9]  }
  0x19   :  { %s33_s21 = sshll.u32 %s1382_s20, 4  ;;  %s65_s23 = sshll.u32 %s1383_s22, 4  ;;  %s34_s21 = int_to_ptr.vmem [resolvable:$true] %s33_s21  ;;  %s66_s23 = int_to_ptr.vmem [resolvable:$true] %s65_s23 }
  0x1a   :  { %s1298_s5 = scalar_lea.vmem %s34_s21, 256  ;;  %p1303_p11 = scmp.lt.s32.totalorder %s34_s21, %s34_s21 }
  0x1b   :  { %p1299_p10 = scmp.ne.s32.totalorder %s34_s21, %s1298_s5  ;;  %p1304_p12 = scmp.lt.s32.totalorder %s1298_s5, %s1298_s5 }
  0x1d   :  { %p1305_p13 = por %p1304_p12, %p1303_p11 }
  0x1f   :  { %p1306_p0 = pnand %p1305_p13, %p1299_p10 }
  0x21   :  { %1309 = shalt.err (!%p1306_p0)
}
  0x22   :  { %39 = dma.hbm_to_vmem [thread:$0]  %s1621_s2, 256, %s34_s21, [#allocation5], %s1380_s30, %s1380_s30, %s1381_s14  }
  0x23   :  { %s1318_s9 = scalar_lea.vmem %s66_s23, 512  ;;  %p1323_p2 = scmp.lt.s32.totalorder %s66_s23, %s66_s23 }
  0x24   :  { %p1319_p1 = scmp.ne.s32.totalorder %s66_s23, %s1318_s9  ;;  %p1324_p3 = scmp.lt.s32.totalorder %s1318_s9, %s1318_s9 }
  0x26   :  { %p1325_p4 = por %p1324_p3, %p1323_p2 }
  0x28   :  { %p1326_p5 = pnand %p1325_p4, %p1319_p1 }
  0x2a   :  { %1329 = shalt.err (!%p1326_p5)
}
  0x2b   :  { %71 = dma.hbm_to_vmem [thread:$0]  %s1627_s8, 512, %s66_s23, [#allocation8], %s1380_s30, %s1380_s30, %s1381_s14  }
  0x2c   :  { %s1384_s28 = smov [#allocation12]  }
  0x2d   :  { %s91_s29 = sshll.u32 %s1384_s28, 4  ;;  %s92_s29 = int_to_ptr.vmem [resolvable:$true] %s91_s29 }
  0x2e   :  { %s1338_s15 = scalar_lea.vmem %s92_s29, 512  ;;  %p1343_p7 = scmp.lt.s32.totalorder %s92_s29, %s92_s29 }
  0x2f   :  { %p1339_p6 = scmp.ne.s32.totalorder %s92_s29, %s1338_s15  ;;  %p1344_p8 = scmp.lt.s32.totalorder %s1338_s15, %s1338_s15 }
  0x31   :  { %p1345_p9 = por %p1344_p8, %p1343_p7 }
  0x33   :  { %p1346_p10 = pnand %p1345_p9, %p1339_p6 }
  0x35   :  { %1349 = shalt.err (!%p1346_p10)
}
  0x36   :  { %97 = dma.hbm_to_vmem [thread:$0]  %s1630_s11, 512, %s92_s29, [#allocation11], %s1380_s30, %s1380_s30, %s1381_s14  }
  0x37   :  { %1370 = dma.done.wait [#allocation5], 256  }
  0x38   :  { %1371 = vsyncadd [#allocation5], 4294967040 }
  0x39   :  { %1372 = dma.done.wait [#allocation8], 1024  }
  0x3a   :  { %1373 = vsyncadd [#allocation8], 4294966272 }
  0x3b   :  { %1374 = dma.done.wait [#allocation11], 1024  }
  0x3c   :  { %1375 = vsyncadd [#allocation11], 4294966272  ;;  %vm125_vm0 = vcmask 261120   ;;  %v123_v0 = vld [vmem:[%s1623_s4 + $0x18] sm:$0xff]  ;;  %v122_v1 = vld [vmem:[%s1623_s4 + $0x10] sm:$0xff]  ;;  %v1385_v7 = vmov 0   ;;  %v214_v10 = vlaneseq  ;;  %v211_v13 = vstv %s1625_s6 }
  0x3d   :  { %1150 = vmatprep.subr.mxu0 %v123_v0  ;;  %v115_v2 = vld [vmem:[#allocation4] sm:$0xff]  ;;  %v121_v3 = vld [vmem:[%s1623_s4 + $0x8] sm:$0xff]  ;;  %1238 = vset.pattern.permute.xlu1 %v1385_v7  ;;  %vm230_vm1 = vcmask 1041409   ;;  %vm234_vm3 = vcmask 58368   ;;  %v1386_v30 = vmov 0.0   ;;  %vm1387_vm4 = vmmov 0  }
  0x3e   :  { %1151 = vmatpush3.msra.mxu0 %v123_v0  ;;  %1158 = vmatprep.mubr.msk.f32.mxu0 %vm125_vm0, %v115_v2  ;;  %v120_v4 = vld [vmem:[%s1623_s4] sm:$0xff]  ;;  %v116_v5 = vld [vmem:[#allocation4 + $0x8] sm:$0xff]  ;;  %v1508_v11 = vand.u32 127, %v214_v10  ;;  %v223_v12 = vshrl.u32 %v214_v10, 7  ;;  %v1388_v32 = vmov 1983009808  }
  0x3f   :  { %1152 = vmatprep.subr.mxu0 %v122_v1  ;;  %v119_v6 = vld [vmem:[%s1619_s0] sm:$0x3]  ;;  %1239 = vset.pattern.permute.xlu0 %v1385_v7  ;;  %v418_v31 = vld [vmem:[#allocation7 + $0x18] sm:$0xff]  ;;  %v424_v33 = vunpack.c.l.s4 %v1388_v32  ;;  %v1389_v40 = vmov 1966171168   ;;  %vm269_vm5 = vcmask 64512  }
  0x40   :  { %1153 = vmatpush3.msra.mxu0 %v122_v1  ;;  %217 = vperm.xlu1 %1238, %v119_v6   ;;  %v1514_v15 = vsub.s32 %v1508_v11, %v223_v12  ;;  %v117_v37 = vld [vmem:[%s1622_s3] sm:$0x3f]  ;;  %v248_v41 = vunpack.c.l.s4 %v1389_v40  ;;  %v1536_v42 = vld [vmem:[%s1622_s3 + $0x8] sm:$0x3f]  ;;  %v416_v0 = vld [vmem:[#allocation7 + $0x8] sm:$0xff]  ;;  %vm619_vm6 = vcmask 1045504  }
  0x41   :  { %1154 = vmatprep.subr.mxu0 %v121_v3  ;;  %1166 = vmatprep.subr.mxu1 %v1386_v30  ;;  %v425_v34 = vunpack.c.0.s8 %v424_v33  ;;  %v422_v38 = vcombine.high %v117_v37, %v117_v37  ;;  %v438_v52 = vcombine.high %v1536_v42, %v1536_v42  ;;  %v417_v62 = vld [vmem:[#allocation7 + $0x10] sm:$0xff]  ;;  %v415_v1 = vld [vmem:[#allocation7] sm:$0xff]  ;;  %v626_v33 = vstv %s1626_s7  ;;  %s1390_s29 = smov [#allocation13]  }
  0x42   :  { %1155 = vmatpush3.msra.mxu0 %v121_v3  ;;  %1167 = vmatpush3.msra.mxu1 %v116_v5  ;;  %v249_v46 = vunpack.c.0.s8 %v248_v41  ;;  %vm646_vm7 = vcmask 41984   ;;  %vm681_vm9 = vcmask 48128   ;;  %s1089_s15 = sshll.u32 %s1390_s29, 4  ;;  %s1090_s15 = int_to_ptr.vmem [resolvable:$true] %s1089_s15 }
  0x43   :  { %1156 = vmatprep.subr.mxu0 %v120_v4  ;;  %1168 = vmatprep.mubr.msk.f32.mxu1 %vm1387_vm4, %v1386_v30  ;;  %v1527_v35 = vsub.s32 %v425_v34, %v223_v12  ;;  %s1350_s2 = scalar_lea.vmem %s1090_s15, 32  ;;  %p1355_p12 = scmp.lt.s32.totalorder %s1090_s15, %s1090_s15 }
  0x44   :  { %1157 = vmatpush3.msra.mxu0 %v120_v4  ;;  %1171 = vmatprep.subr.mxu1 %v418_v31  ;;  %v1541_v49 = vsub.s32 %v249_v46, %v223_v12  ;;  %p1351_p11 = scmp.ne.s32.totalorder %s1090_s15, %s1350_s2  ;;  %p1356_p13 = scmp.lt.s32.totalorder %s1350_s2, %s1350_s2 }
  0x45   :  { %1159 = vmatmul.mubr.msk.f32.vlgmr.msra.gmra.mxu0 %vm125_vm0, %v116_v5  ;;  %1161 = vmatprep.subr.mxu0 %v1386_v30  ;;  %v429_v39 = vrot.slane %v117_v37, %v1527_v35  ;;  %v436_v43 = vrot.slane %v422_v38, %v1527_v35  ;;  %v445_v45 = vrot.slane %v1536_v42, %v1527_v35 }
  0x46   :  { %1163 = vmatprep.mubr.msk.f32.mxu0 %vm1387_vm4, %v1386_v30  ;;  %1162 = vmatpush3.msra.mxu0 %v115_v2  ;;  %v452_v59 = vrot.slane %v438_v52, %v1527_v35  ;;  %p1357_p0 = por %p1356_p13, %p1355_p12 }
  0x47   :  { %1182 = vmatprep.subr.mxu0 %v1386_v30  ;;  %v437_v44 = vcombine.high %v429_v39, %v429_v39  ;;  %v455_v48 = vcombine.low %v436_v43, %v445_v45  ;;  %v453_v58 = vcombine.high %v445_v45, %v445_v45 }
  0x48   :  { %p1358_p1 = pnand %p1357_p0, %p1351_p11 }
  0x49   :  { %v454_v47 = vcombine.low %v429_v39, %v437_v44  ;;  %v469_v54 = vrot.slane %v455_v48, %v1527_v35  ;;  %v471_v63 = vcombine.low %v453_v58, %v452_v59  ;;  %v836_v58 = vld [vmem:[#allocation10 + $0x10] sm:$0xff]  ;;  %v835_v59 = vld [vmem:[#allocation10 + $0x8] sm:$0xff] }
  0x4b   :  { %v462_v53 = vrot.slane %v454_v47, %v1527_v35  ;;  %v478_v2 = vrot.slane %v471_v63, %v1527_v35 }
  0x4d   :  { %v470_v60 = vcombine.low %v462_v53, %v469_v54 }
  0xbb   :  { %v218_v18 = vpop.permute.xlu1 %217 }
  0xbc   :  { %vm219_vm2 = vcmp.lt.s32.totalorder %v1508_v11, %v218_v18 }
 0x105   :  { %v1160_v8 = vpop.f32.mrf.mxu0 }
 0x107   :  { %v198_v9 = vpop.f32.mrf.mxu0 }
 0x108   :  { %207 = vadd.xlane.f32.xlu0 %v198_v9 }
 0x10c   :  { %209 = vadd.xlane.f32.xlu0 %v1160_v8 }
 0x191   :  { %v208_v14 = vpop.xlane.xlu0 %207 }
 0x192   :  { %v212_v16 = vadd.f32 %v211_v13, %v208_v14 }
 0x194   :  { %v225_v20 = vrot.slane %v212_v16, %v1514_v15 }
 0x195   :  { %v210_v17 = vpop.xlane.xlu0 %209 }
 0x196   :  { %v213_v19 = vadd.f32 %v211_v13, %v210_v17 }
 0x198   :  { %v229_v21 = vrot.slane %v213_v19, %v1514_v15 }
 0x19a   :  { %v231_v22 = vsel %vm230_vm1, %v229_v21, %v225_v20 }
 0x19b   :  { %v233_v23 = vsel %vm219_vm2, %v231_v22, -inf }
 0x19c   :  { %v235_v24 = vsel %vm234_vm3, %v233_v23, -inf }
 0x19d   :  { %236 = vmax.xlane.f32.xlu1 %v235_v24 }
 0x226   :  { %v237_v25 = vpop.xlane.xlu1 %236 }
 0x227   :  { %v238_v26 = vsub.f32 %v233_v23, %v237_v25 }
 0x229   :  { %v239_v27 = vmul.f32 1.442695, %v238_v26 }
 0x22b   :  { %1242 = vpow2.f32 %v239_v27 }
 0x238   :  { %v1243_v28 = vpop.eup %1242 }
 0x239   :  { %v241_v29 = vsel %vm234_vm3, %v1243_v28, 0.0 }
 0x23a   :  { %242 = vadd.xlane.f32.xlu0 %v241_v29 }
 0x2c3   :  { %v243_v36 = vpop.xlane.xlu0 %242 }
 0x2c4   :  { %1244 = vrcp.f32 %v243_v36 }
 0x2d1   :  { %v1245_v50 = vpop.eup %1244 }
 0x2d2   :  { %v245_v51 = vmul.f32 %v1245_v50, %v1243_v28 }
 0x2d4   :  { %v253_v55 = vrot.slane %v245_v51, %v1541_v49 }
 0x2d6   :  { %v261_v56 = vrot.slane %v253_v55, %v1541_v49  ;;  %v254_v57 = vcombine.high %v253_v55, %v253_v55  ;;  %v833_v55 = vld [vmem:[#allocation9 + $0x18] sm:$0xff] }
 0x2d8   :  { %1164 = vmatmul.mubr.msk.f32.vlgmr.msra.gmra.mxu0 %vm269_vm5, %v261_v56  ;;  %v268_v61 = vrot.slane %v254_v57, %v1541_v49  ;;  %v832_v56 = vld [vmem:[#allocation9 + $0x10] sm:$0xff]  ;;  %v831_v57 = vld [vmem:[#allocation9 + $0x8] sm:$0xff] }
 0x2d9   :  { %1184 = vmatprep.mubr.msk.f32.mxu0 %vm1387_vm4, %v1386_v30  ;;  %1183 = vmatpush3.msk.msra.mxu0 %vm619_vm6, %v117_v37 }
 0x2da   :  { %1169 = vmatmul.mubr.msk.f32.vlgmr.msra.gmra.mxu1 %vm269_vm5, %v268_v61  ;;  %1187 = vmatprep.subr.mxu0 %v1386_v30 }
 0x2db   :  { %1172 = vmatpush3.msra.mxu1 %v418_v31  ;;  %1179 = vmatprep.mubr.msk.f32.mxu1 %vm125_vm0, %v470_v60  ;;  %v414_v31 = vld [vmem:[%s1620_s1] sm:$0x3]  ;;  %v834_v60 = vld [vmem:[#allocation10] sm:$0xff] }
 0x2dc   :  { %1173 = vmatprep.subr.mxu1 %v417_v62 }
 0x2dd   :  { %1174 = vmatpush3.msra.mxu1 %v417_v62 }
 0x2de   :  { %1175 = vmatprep.subr.mxu1 %v416_v0 }
 0x2df   :  { %1176 = vmatpush3.msra.mxu1 %v416_v0 }
 0x2e0   :  { %1177 = vmatprep.subr.mxu1 %v415_v1 }
 0x2e1   :  { %1178 = vmatpush3.msra.mxu1 %v415_v1 }
 0x2e2   :  { %1180 = vmatmul.mubr.msk.f32.vlgmr.msra.gmra.mxu1 %vm125_vm0, %v478_v2  ;;  %1192 = vmatprep.subr.mxu1 %v1386_v30  ;;  %v1001_v2 = vld [vmem:[#allocation12 + $0x18] sm:$0xff] }
 0x2e3   :  { %1200 = vmatprep.mubr.msk.f32.mxu1 %vm1387_vm4, %v1386_v30 }
 0x398   :  { %v338_v3 = vpop.f32.mrf.mxu0 }
 0x39a   :  { %v1165_v4 = vpop.f32.mrf.mxu0  ;;  %v410_v5 = vpop.f32.mrf.mxu1 }
 0x39b   :  { %v916_v6 = vrot.slane %v410_v5, 7 }
 0x39c   :  { %v1170_v7 = vpop.f32.mrf.mxu1 }
 0x39d   :  { %v1562_v8 = vsel %vm230_vm1, %v916_v6, %v338_v3  ;;  %v1000_v6 = vld [vmem:[#allocation12 + $0x10] sm:$0xff]  ;;  %v999_v7 = vld [vmem:[#allocation12 + $0x8] sm:$0xff] }
 0x3a2   :  { %v1181_v9 = vpop.f32.mrf.mxu1 }
 0x3a3   :  { %v583_v12 = vrot.slane %v1181_v9, %v1527_v35 }
 0x3a4   :  { %v549_v10 = vpop.f32.mrf.mxu1 }
 0x3a5   :  { %v560_v13 = vcombine.high %v549_v10, %v549_v10  ;;  %v567_v14 = vrot.slane %v549_v10, %v1527_v35  ;;  %v584_v18 = vcombine.high %v583_v12, %v583_v12  ;;  %v1112_v10 = vld [vmem:[%s1629_s10] ss:$0 sm:$0xff] }
 0x3a7   :  { %v574_v16 = vrot.slane %v560_v13, %v1527_v35  ;;  %v575_v17 = vcombine.high %v567_v14, %v567_v14  ;;  %v615_v26 = vrot.slane %v584_v18, %v1527_v35 }
 0x3a9   :  { %v576_v19 = vcombine.high %v574_v16, %v574_v16  ;;  %v585_v20 = vcombine.low %v567_v14, %v575_v17  ;;  %v599_v22 = vrot.slane %v574_v16, %v1527_v35  ;;  %v1113_v16 = vld [vmem:[%s1631_s12] ss:$0 sm:$0xff] }
 0x3ab   :  { %v592_v21 = vrot.slane %v585_v20, %v1527_v35  ;;  %v601_v23 = vcombine.low %v576_v19, %v583_v12 }
 0x3ad   :  { %v600_v24 = vcombine.low %v592_v21, %v599_v22  ;;  %v608_v25 = vrot.slane %v601_v23, %v1527_v35 }
 0x3af   :  { %v620_v27 = vsel %vm619_vm6, %v600_v24, 0.0  ;;  %v616_v28 = vcombine.low %v608_v25, %v615_v26 }
 0x3b0   :  { %621 = vadd.xlane.f32.xlu0 %v620_v27 }
 0x3b1   :  { %v623_v29 = vsel %vm619_vm6, %v616_v28, 0.0 }
 0x3b4   :  { %624 = vadd.xlane.f32.xlu0 %v623_v29 }
 0x3ca   :  { %630 = vperm.xlu0 %1239, %v414_v31  }
 0x439   :  { %v622_v32 = vpop.xlane.xlu0 %621 }
 0x43a   :  { %v627_v35 = vadd.f32 %v626_v33, %v622_v32 }
 0x43c   :  { %v638_v38 = vrot.slane %v627_v35, %v1514_v15 }
 0x43d   :  { %v625_v34 = vpop.xlane.xlu0 %624 }
 0x43e   :  { %v628_v36 = vadd.f32 %v626_v33, %v625_v34 }
 0x440   :  { %v642_v37 = vrot.slane %v628_v36, %v1514_v15 }
 0x442   :  { %v643_v40 = vsel %vm230_vm1, %v642_v37, %v638_v38 }
 0x445   :  { %v631_v39 = vpop.permute.xlu0 %630 }
 0x446   :  { %vm632_vm8 = vcmp.lt.s32.totalorder %v1508_v11, %v631_v39 }
 0x447   :  { %v645_v41 = vsel %vm632_vm8, %v643_v40, -inf }
 0x448   :  { %v647_v43 = vsel %vm646_vm7, %v645_v41, -inf }
 0x449   :  { %648 = vmax.xlane.f32.xlu1 %v647_v43 }
 0x4d2   :  { %v649_v44 = vpop.xlane.xlu1 %648 }
 0x4d3   :  { %v650_v45 = vsub.f32 %v645_v41, %v649_v44 }
 0x4d5   :  { %v651_v46 = vmul.f32 1.442695, %v650_v45 }
 0x4d7   :  { %1246 = vpow2.f32 %v651_v46 }
 0x4e4   :  { %v1247_v47 = vpop.eup %1246 }
 0x4e5   :  { %v653_v48 = vsel %vm646_vm7, %v1247_v47, 0.0 }
 0x4e6   :  { %654 = vadd.xlane.f32.xlu1 %v653_v48 }
 0x56f   :  { %v655_v50 = vpop.xlane.xlu1 %654 }
 0x570   :  { %1248 = vrcp.f32 %v655_v50 }
 0x57d   :  { %v1249_v51 = vpop.eup %1248 }
 0x57e   :  { %v657_v15 = vmul.f32 %v1249_v51, %v1247_v47 }
 0x580   :  { %v665_v52 = vrot.slane %v657_v15, %v1541_v49 }
 0x582   :  { %v673_v11 = vrot.slane %v665_v52, %v1541_v49  ;;  %v666_v53 = vcombine.high %v665_v52, %v665_v52 }
 0x584   :  { %1185 = vmatmul.mubr.msk.f32.vlgmr.msra.gmra.mxu0 %vm681_vm9, %v673_v11  ;;  %v680_v54 = vrot.slane %v666_v53, %v1541_v49  ;;  %v837_v49 = vld [vmem:[#allocation10 + $0x18] sm:$0xff] }
 0x585   :  { %1188 = vmatpush3.msk.msra.mxu0 %vm619_vm6, %v1536_v42  ;;  %1189 = vmatprep.mubr.msk.f32.mxu0 %vm1387_vm4, %v1386_v30  ;;  %v830_v42 = vld [vmem:[#allocation9] sm:$0xff] }
 0x586   :  { %1203 = vmatprep.subr.mxu0 %v1386_v30  ;;  %1193 = vmatpush3.msra.mxu1 %v837_v49 }
 0x587   :  { %1194 = vmatprep.subr.mxu1 %v1386_v30 }
 0x588   :  { %1190 = vmatmul.mubr.msk.f32.vlgmr.msra.gmra.mxu0 %vm681_vm9, %v680_v54  ;;  %1195 = vmatpush3.msra.mxu1 %v836_v58 }
 0x589   :  { %1204 = vmatpush3.msra.mxu0 %v833_v55  ;;  %1211 = vmatprep.mubr.msk.f32.mxu0 %vm1387_vm4, %v1386_v30 }
 0x58a   :  { %1205 = vmatprep.subr.mxu0 %v1386_v30  ;;  %1196 = vmatprep.subr.mxu1 %v1386_v30 }
 0x58b   :  { %1206 = vmatpush3.msra.mxu0 %v832_v56  ;;  %1197 = vmatpush3.msra.mxu1 %v835_v59 }
 0x58c   :  { %1207 = vmatprep.subr.mxu0 %v1386_v30  ;;  %1198 = vmatprep.subr.mxu1 %v1386_v30 }
 0x58d   :  { %1208 = vmatpush3.msra.mxu0 %v831_v57  ;;  %1199 = vmatpush3.msra.mxu1 %v834_v60 }
 0x58e   :  { %1209 = vmatprep.subr.mxu0 %v1386_v30  ;;  %1214 = vmatprep.subr.mxu1 %v1386_v30 }
 0x58f   :  { %1210 = vmatpush3.msra.mxu0 %v830_v42 }
 0x590   :  { %1212 = vmatmul.mubr.msk.f32.vlgmr.msra.gmra.mxu0 %vm125_vm0, %v1562_v8  ;;  %v998_v8 = vld [vmem:[#allocation12] sm:$0xff] }
 0x644   :  { %v752_v61 = vpop.f32.mrf.mxu0 }
 0x646   :  { %v1186_v62 = vpop.f32.mrf.mxu0 }
 0x648   :  { %v826_v63 = vpop.f32.mrf.mxu0 }
 0x649   :  { %v840_v0 = vrot.slane %v826_v63, 7 }
 0x64a   :  { %v1191_v1 = vpop.f32.mrf.mxu0 }
 0x64b   :  { %v841_v3 = vsel %vm230_vm1, %v840_v0, %v752_v61 }
 0x64c   :  { %1201 = vmatmul.mubr.msk.f32.vlgmr.msra.gmra.mxu1 %vm125_vm0, %v841_v3 }
 0x64d   :  { %1215 = vmatpush3.msra.mxu1 %v1001_v2  ;;  %1222 = vmatprep.mubr.msk.f32.mxu1 %vm1387_vm4, %v1386_v30 }
 0x64e   :  { %1216 = vmatprep.subr.mxu1 %v1386_v30 }
 0x64f   :  { %1217 = vmatpush3.msra.mxu1 %v1000_v6 }
 0x650   :  { %v986_v4 = vpop.f32.mrf.mxu0  ;;  %1218 = vmatprep.subr.mxu1 %v1386_v30 }
 0x651   :  { %1219 = vmatpush3.msra.mxu1 %v999_v7 }
 0x652   :  { %v1213_v5 = vpop.f32.mrf.mxu0  ;;  %1220 = vmatprep.subr.mxu1 %v1386_v30 }
 0x653   :  { %1221 = vmatpush3.msra.mxu1 %v998_v8 }
 0x70c   :  { %v910_v9 = vpop.f32.mrf.mxu1 }
 0x70d   :  { %v987_v12 = vadd.f32 %v986_v4, %v910_v9 }
 0x70e   :  { %v1202_v13 = vpop.f32.mrf.mxu1 }
 0x70f   :  { %v997_v14 = vadd.f32 %v1112_v10, %v987_v12 }
 0x711   :  { %1223 = vmatmul.mubr.msk.f32.vlgmr.msra.gmra.mxu1 %vm125_vm0, %v997_v14 }
 0x7d1   :  { %v1078_v17 = vpop.f32.mrf.mxu1 }
 0x7d2   :  { %v1079_v18 = vadd.f32 %v1113_v16, %v1078_v17 }
 0x7d3   :  { %v1224_v30 = vpop.f32.mrf.mxu1 }
 0x7d4   :  { %1082 = vst [vmem:[#allocation13] sm:$0x3] %v1079_v18 }
 0x7d5   :  { %1361 = shalt.err (!%p1358_p1)
}
 0x7d6   :  { %1092 = dma.vmem_to_hbm [thread:$0]  %s1090_s15, 32, %s1632_s13, [#allocation6]  }
 0x7d7   :  { %1376 = dma.done.wait [#allocation6], 32  }
 0x7d8   :  { %1377 = vsyncadd [#allocation6], 4294967264 }
 0x7d9   :  { %1096 = vsyncpa [#allocation5], 1 }
 0x7da   :  { %1097 = vsyncpa [#allocation8], 1 }
 0x7db   :  { %1098 = vsyncpa [#allocation11], 1 }
 0x7dc   :  { %1099 = vsyncpa [#allocation6], 1 }

</bundles_post_ra>
